<compile_context>
chip_gen: v5e
topology: v5e:2x2
jax: 0.10.0
libtpu: 0.0.40
codegen_flags: <defaults>
</compile_context>

<pallas_src>
import jax
import jax.numpy as jnp
from jax.experimental import pallas as pl
from jax.experimental.pallas import tpu as pltpu


def actor_critic_kernel(obs_ref, w1_ref, w2_ref, out_ref):
    """Fused forward for one batch tile.

    obs_ref : (TB, n_inputs)          bf16
    w1_ref  : (n_inputs, 2*F)         bf16   = [Wc1.T | Wa1.T]
    w2_ref  : (2*F, 2*A)              bf16   = blockdiag(Wc2.T, Wa2.T)
    out_ref : (TB, 2*A)               f32    = [value | softmax(logits)]
    """
    n_actions = out_ref.shape[-1] // 2

    obs = obs_ref[...]
    # fused layer 1 (single MXU pass for both branches) + single ReLU, f32 math
    h = jnp.dot(obs, w1_ref[...], preferred_element_type=jnp.float32)
    h = jnp.maximum(h, 0.0)

    # fused layer 2 (block-diagonal weight) -> [value | logits]
    fused = jnp.dot(h.astype(w2_ref.dtype), w2_ref[...],
                    preferred_element_type=jnp.float32)

    value = fused[:, :n_actions]
    logits = fused[:, n_actions:]

    # numerically-stable softmax over the action axis (matches nn.Softmax on 2-D input)
    m = jnp.max(logits, axis=-1, keepdims=True)
    e = jnp.exp(logits - m)
    denom = jnp.sum(e, axis=-1, keepdims=True)
    dist = e * pl.reciprocal(denom, approx=True)        # EUP vrcp, frees VALU

    out_ref[...] = jnp.concatenate([value, dist], axis=-1).astype(out_ref.dtype)


def actor_critic_forward(obs, wc1, wc2, wa1, wa2, *, tb=64):
    """obs: (B, n_inputs) f32. Weights in PyTorch (out, in) layout, f32.

    Returns (value (B, n_actions), actions_dist (B, n_actions)), both f32.
    """
    B, n_inputs = obs.shape
    n_features = wc1.shape[0]
    n_actions = wc2.shape[0]

    tb = min(tb, B)
    assert B % tb == 0, "batch must be divisible by the batch tile"

    # Fused layer-1 weight: (n_inputs, 2*F) = [Wc1.T | Wa1.T]
    w1 = jnp.concatenate([wc1.T, wa1.T], axis=1).astype(jnp.bfloat16)

    # Fused layer-2 weight: block-diagonal (2*F, 2*A) = blockdiag(Wc2.T, Wa2.T)
    zero = jnp.zeros((n_features, n_actions), jnp.float32)
    w2 = jnp.concatenate(
        [jnp.concatenate([wc2.T, zero], axis=1),
         jnp.concatenate([zero, wa2.T], axis=1)],
        axis=0,
    ).astype(jnp.bfloat16)

    obs_bf16 = obs.astype(jnp.bfloat16)

    fused = pl.pallas_call(
        actor_critic_kernel,
        out_shape=jax.ShapeDtypeStruct((B, 2 * n_actions), jnp.float32),
        grid=(B // tb,),
        in_specs=[
            pl.BlockSpec((tb, n_inputs), lambda i: (i, 0)),            # batch-tiled obs
            pl.BlockSpec(w1.shape, lambda i: (0, 0)),                  # weights resident
            pl.BlockSpec(w2.shape, lambda i: (0, 0)),
        ],
        out_specs=pl.BlockSpec((tb, 2 * n_actions), lambda i: (i, 0)),
        compiler_params=pltpu.CompilerParams(
            dimension_semantics=("parallel",),                          # v7x: 2 TCs
        ),
    )(obs_bf16, w1, w2)

    value = fused[:, :n_actions]
    actions_dist = fused[:, n_actions:]
    return value, actions_dist


def xavier_normal(key, fan_out, fan_in):
    # torch.nn.init.xavier_normal_ : std = sqrt(2 / (fan_in + fan_out)), weight (out, in)
    std = (2.0 / (fan_in + fan_out)) ** 0.5
    return std * jax.random.normal(key, (fan_out, fan_in), dtype=jnp.float32)


if __name__ == "__main__":
    # Small shapes consistent with the module (critic head is Linear(F, n_actions),
    # exactly as in the original ActorCritic, and all Linear layers have bias=False).
    B = 128          # batch of observations (gives a 2-step parallel grid at tb=64)
    n_inputs = 16    # observation size
    n_features = 64  # hidden dim (module default)
    n_actions = 8    # action space size

    root = jax.random.PRNGKey(0)
    k_obs, k_c1, k_c2, k_a1, k_a2 = jax.random.split(root, 5)

    obs = jax.random.normal(k_obs, (B, n_inputs), dtype=jnp.float32)

    # PyTorch Linear weights are (out, in); the wrapper handles transpose + fusion.
    wc1 = xavier_normal(k_c1, n_features, n_inputs)
    wc2 = xavier_normal(k_c2, n_actions, n_features)
    wa1 = xavier_normal(k_a1, n_features, n_inputs)
    wa2 = xavier_normal(k_a2, n_actions, n_features)

    value, actions_dist = actor_critic_forward(obs, wc1, wc2, wa1, wa2, tb=64)
    jax.block_until_ready((value, actions_dist))

    # Reference with the same bf16-operand / f32-accumulate precision pattern.
    def ref_forward(obs, wc1, wc2, wa1, wa2):
        ob = obs.astype(jnp.bfloat16)
        hc = jnp.maximum(jnp.dot(ob, wc1.T.astype(jnp.bfloat16),
                                 preferred_element_type=jnp.float32), 0.0)
        val = jnp.dot(hc.astype(jnp.bfloat16), wc2.T.astype(jnp.bfloat16),
                      preferred_element_type=jnp.float32)
        ha = jnp.maximum(jnp.dot(ob, wa1.T.astype(jnp.bfloat16),
                                 preferred_element_type=jnp.float32), 0.0)
        logits = jnp.dot(ha.astype(jnp.bfloat16), wa2.T.astype(jnp.bfloat16),
                         preferred_element_type=jnp.float32)
        return val, jax.nn.softmax(logits, axis=-1)

    ref_value, ref_dist = ref_forward(obs, wc1, wc2, wa1, wa2)

    assert jnp.allclose(value, ref_value, atol=5e-3, rtol=5e-3)
    assert jnp.allclose(actions_dist, ref_dist, atol=5e-3, rtol=5e-3)
    assert jnp.allclose(jnp.sum(actions_dist, axis=-1), 1.0, atol=5e-3)

    print("KERNEL_OK")
</pallas_src>

<mosaic_0001>
module attributes {stable_mosaic.version = 11 : i64} {
  func.func @actor_critic_kernel(%arg0: i32, %arg1: memref<64x16xbf16, #tpu.memory_space<vmem>>, %arg2: memref<16x128xbf16, #tpu.memory_space<vmem>>, %arg3: memref<128x16xbf16, #tpu.memory_space<vmem>>, %arg4: memref<64x16xf32, #tpu.memory_space<vmem>>) attributes {dimension_semantics = [#tpu.dimension_semantics<parallel>], iteration_bounds = array<i64: 2>, scalar_prefetch = 0 : i64, scratch_operands = 0 : i64, tpu.core_type = #tpu.core_type<tc>, window_params = [{transform_indices = @transform_0, window_bounds = array<i64: 64, 16>}, {pipeline_mode = #tpu.pipeline_mode<synchronous>, transform_indices = @transform_1, window_bounds = array<i64: 16, 128>}, {pipeline_mode = #tpu.pipeline_mode<synchronous>, transform_indices = @transform_2, window_bounds = array<i64: 128, 16>}, {transform_indices = @transform_3, window_bounds = array<i64: 64, 16>}]} {
    %c0 = arith.constant 0 : index
    %c0_0 = arith.constant 0 : index
    %0 = vector.load %arg1[%c0, %c0_0] : memref<64x16xbf16, #tpu.memory_space<vmem>>, vector<64x16xbf16>
    %c0_1 = arith.constant 0 : index
    %c0_2 = arith.constant 0 : index
    %1 = vector.load %arg2[%c0_1, %c0_2] : memref<16x128xbf16, #tpu.memory_space<vmem>>, vector<16x128xbf16>
    %cst = arith.constant dense<0.000000e+00> : vector<64x128xf32>
    %2 = tpu.matmul %0, %1, %cst {dimension_numbers = #tpu.dot_dimension_numbers<[1], [0], [0], [1], [0, 0, 1, 1], [], []>} : vector<64x16xbf16>, vector<16x128xbf16>, vector<64x128xf32> -> vector<64x128xf32>
    %cst_3 = arith.constant 0.000000e+00 : f32
    %3 = vector.broadcast %cst_3 : f32 to vector<64x128xf32>
    %4 = arith.maximumf %2, %3 : vector<64x128xf32>
    %5 = arith.truncf %4 : vector<64x128xf32> to vector<64x128xbf16>
    %c0_4 = arith.constant 0 : index
    %c0_5 = arith.constant 0 : index
    %6 = vector.load %arg3[%c0_4, %c0_5] : memref<128x16xbf16, #tpu.memory_space<vmem>>, vector<128x16xbf16>
    %cst_6 = arith.constant dense<0.000000e+00> : vector<64x16xf32>
    %7 = tpu.matmul %5, %6, %cst_6 {dimension_numbers = #tpu.dot_dimension_numbers<[1], [0], [0], [1], [0, 0, 1, 1], [], []>} : vector<64x128xbf16>, vector<128x16xbf16>, vector<64x16xf32> -> vector<64x16xf32>
    %8 = vector.extract_strided_slice %7 {offsets = [0, 0], sizes = [64, 8], strides = [1, 1]} : vector<64x16xf32> to vector<64x8xf32>
    %9 = vector.extract_strided_slice %7 {offsets = [0, 8], sizes = [64, 8], strides = [1, 1]} : vector<64x16xf32> to vector<64x8xf32>
    %cst_7 = arith.constant dense<0xFF800000> : vector<64xf32>
    %10 = vector.multi_reduction <maximumf>, %9, %cst_7 [1] : vector<64x8xf32> to vector<64xf32>
    %11 = vector.shape_cast %10 : vector<64xf32> to vector<64x1xf32>
    %12 = vector.broadcast %11 : vector<64x1xf32> to vector<64x8xf32>
    %13 = arith.subf %9, %12 : vector<64x8xf32>
    %14 = math.exp %13 : vector<64x8xf32>
    %cst_8 = arith.constant dense<0.000000e+00> : vector<64xf32>
    %15 = vector.multi_reduction <add>, %14, %cst_8 [1] : vector<64x8xf32> to vector<64xf32>
    %16 = vector.shape_cast %15 : vector<64xf32> to vector<64x1xf32>
    %17 = tpu.reciprocal %16 {approx = true} : vector<64x1xf32> -> vector<64x1xf32>
    %18 = vector.broadcast %17 : vector<64x1xf32> to vector<64x8xf32>
    %19 = arith.mulf %14, %18 : vector<64x8xf32>
    %20 = tpu.concatenate %8, %19 in 1 : vector<64x8xf32>, vector<64x8xf32> -> vector<64x16xf32>
    %c0_9 = arith.constant 0 : index
    %c0_10 = arith.constant 0 : index
    %21 = vector.load %arg4[%c0_9, %c0_10] : memref<64x16xf32, #tpu.memory_space<vmem>>, vector<64x16xf32>
    tpu.vector_store %arg4[%c0_9, %c0_10], %20 {strides = array<i32>} : memref<64x16xf32, #tpu.memory_space<vmem>>, vector<64x16xf32>,
    return
  }
  func.func @transform_0(%arg0: i32) -> (i32, i32) {
    %c0_i32 = arith.constant 0 : i32
    %c0_i32_0 = arith.constant 0 : i32
    return %arg0, %c0_i32 : i32, i32
  }
  func.func @transform_1(%arg0: i32) -> (i32, i32) {
    %c0_i32 = arith.constant 0 : i32
    %c0_i32_0 = arith.constant 0 : i32
    %c0_i32_1 = arith.constant 0 : i32
    return %c0_i32, %c0_i32_0 : i32, i32
  }
  func.func @transform_2(%arg0: i32) -> (i32, i32) {
    %c0_i32 = arith.constant 0 : i32
    %c0_i32_0 = arith.constant 0 : i32
    %c0_i32_1 = arith.constant 0 : i32
    return %c0_i32, %c0_i32_0 : i32, i32
  }
  func.func @transform_3(%arg0: i32) -> (i32, i32) {
    %c0_i32 = arith.constant 0 : i32
    %c0_i32_0 = arith.constant 0 : i32
    return %arg0, %c0_i32 : i32, i32
  }
}

</mosaic_0001>

<bundles_post_ra>
// kernel: tpu_custom_call.1
= control target key start
LH: loop header
LB: loop body
LE: loop exit
PB: predicated region body
PF: predicated region fallthrough
CT: control target
= control target key end

     0   :  { %s719_s12 = smov 0   ;;  %s889_s0 = inlined_call_operand.vmem [shape: bf16[128,16], index: 0, kind: input, shape index: {}]   ;;  %s890_s1 = inlined_call_operand.vmem [shape: bf16[16,128], index: 1, kind: input, shape index: {}]   ;;  %s891_s2 = inlined_call_operand.vmem [shape: bf16[128,16], index: 2, kind: input, shape index: {}]   ;;  %s892_s3 = inlined_call_operand.vmem [shape: f32[128,16], index: 3, kind: output, shape index: {}]  }
   0x1 LB: > { %s552_s13 = sadd.s32 4294967295, %s696_s12   ;;  %p556_p0 = scmp.ge.s32.totalorder %s696_s12, 1  ;;  %s696_s12 = sphi %s719_s12, %s13_s12  }
   0x2   : > { %p138_p1 = scmp.lt.s32.totalorder %s696_s12, 3 }
   0x4   : > { %p139_p2 = pnand %p556_p0, %p138_p1 }
   0x5   : > { %s557_s16 = sshll.u32 (!%p139_p2), %s552_s13, 3  ;;  %s698_s10 = smov (!%p139_p2), 120  }
   0x6   : > { %142 = sbr.rel (%p139_p2) target bundleno = 702 (0x2be), region = 32  ;;  %p163_p3 = scmp.lt.s32.totalorder (!%p139_p2), %s557_s16, 15 }
   0xb   : > { %v623_v0 = vld [vmem:[%s890_s1] sm:$0xff]  ;;  %s894_s16 = smov (!%p163_p3, %s557_s16), 15  ;;  %vm211_vm0 = vcmask 130048   ;;  %v631_v3 = vld [vmem:[%s891_s2 + $0x38] sm:$0xff]  ;;  %v630_v4 = vld [vmem:[%s891_s2 + $0x30] sm:$0xff]  ;;  %vm358_vm1 = vcmask 130112  }
   0xc   : > { %231 = vmatpush.bf16.msra.mxu0 %v623_v0  ;;  %632 = vmatpush.bf16.msra.mxu3 %v623_v0  ;;  %s558_s17 = sshll.u32 %s894_s16, 2  ;;  %v629_v5 = vld [vmem:[%s891_s2 + $0x28] sm:$0xff]  ;;  %v628_v6 = vld [vmem:[%s891_s2 + $0x20] sm:$0xff]  ;;  %v627_v8 = vld [vmem:[%s891_s2 + $0x18] sm:$0xff]  ;;  %vm439_vm2 = vcmask 64512   ;;  %s560_s11 = sshll.u32 %s894_s16, 3 }
   0xd   : > { %s166_s20 = scalar_lea.vmem %s889_s0, %s558_s17  ;;  %633 = vmatpush.bf16.msra.mxu1 %v631_v3  ;;  %634 = vmatpush.bf16.msra.mxu2 %v631_v3  ;;  %v626_v10 = vld [vmem:[%s891_s2 + $0x10] sm:$0xff]  ;;  %v625_v11 = vld [vmem:[%s891_s2 + $0x8] sm:$0xff]  ;;  %v624_v12 = vld [vmem:[%s891_s2] sm:$0xff]  ;;  %s845_s15 = scalar_lea.vmem %s892_s3, %s560_s11 }
   0xe   : > { %v619_v1 = vld [vmem:[%s166_s20] sm:$0xff]  ;;  %v620_v2 = vld [vmem:[%s166_s20 + $0x8] sm:$0xff]  ;;  %v621_v7 = vld [vmem:[%s166_s20 + $0x10] sm:$0xff] }
   0xf   : > { %581 = vmatmul.msk.bf16.vlgmr.msra.gmra.mxu0 %vm211_vm0, %v619_v1  ;;  %582 = vmatmul.msk.bf16.vlgmr.msra.gmra.mxu3 %vm211_vm0, %v620_v2  ;;  %v622_v9 = vld [vmem:[%s166_s20 + $0x18] sm:$0xff] }
  0x10   : > { %329 = vmatpush.bf16.msrb.mxu0 %v631_v3 }
  0x11   : > { %635 = vmatpush.bf16.msra.mxu1 %v630_v4  ;;  %636 = vmatpush.bf16.msra.mxu2 %v630_v4 }
  0x14   : > { %330 = vmatpush.bf16.msrb.mxu0 %v630_v4 }
  0x15   : > { %637 = vmatpush.bf16.msra.mxu1 %v629_v5  ;;  %638 = vmatpush.bf16.msra.mxu2 %v629_v5 }
  0x18   : > { %331 = vmatpush.bf16.msrb.mxu0 %v629_v5 }
  0x19   : > { %639 = vmatpush.bf16.msra.mxu1 %v628_v6  ;;  %640 = vmatpush.bf16.msra.mxu2 %v628_v6 }
  0x1c   : > { %332 = vmatpush.bf16.msrb.mxu0 %v628_v6 }
  0x1d   : > { %641 = vmatpush.bf16.msra.mxu1 %v627_v8  ;;  %642 = vmatpush.bf16.msra.mxu2 %v627_v8 }
  0x1f   : > { %583 = vmatmul.msk.bf16.gmra.mxu3 %vm211_vm0, %v621_v7 }
  0x20   : > { %333 = vmatpush.bf16.msrb.mxu0 %v627_v8 }
  0x21   : > { %643 = vmatpush.bf16.msra.mxu1 %v626_v10  ;;  %644 = vmatpush.bf16.msra.mxu2 %v626_v10 }
  0x24   : > { %334 = vmatpush.bf16.msrb.mxu0 %v626_v10 }
  0x25   : > { %645 = vmatpush.bf16.msra.mxu1 %v625_v11  ;;  %646 = vmatpush.bf16.msra.mxu2 %v625_v11 }
  0x28   : > { %335 = vmatpush.bf16.msrb.mxu0 %v625_v11 }
  0x29   : > { %647 = vmatpush.bf16.msra.mxu1 %v624_v12  ;;  %648 = vmatpush.bf16.msra.mxu2 %v624_v12 }
  0x2c   : > { %336 = vmatpush.bf16.msrb.mxu0 %v624_v12 }
  0x2f   : > { %584 = vmatmul.msk.bf16.gmra.mxu3 %vm211_vm0, %v622_v9 }
  0x8c   : > { %v233_v13 = vpop.f32.mrf.mxu0 }
  0x8d   : > { %v253_v15 = vmax.f32 %v233_v13, 0.0 }
  0x92   : > { %v238_v14 = vpop.f32.mrf.mxu3 }
  0x93   : > { %v255_v20 = vmax.f32 %v238_v14, 0.0 }
  0x94   : > { %v235_v16 = vpop.f32.mrf.mxu0 }
  0x95   : > { %v254_v17 = vmax.f32 %v235_v16, 0.0 }
  0x97   : > { %v261_v18 = vpack.c.bf16 %v254_v17, %v253_v15 }
  0x99   : > { %337 = vmatmul.bf16.vlgmr.msrb.gmra.mxu0 %v261_v18 }
  0x9a   : > { %v240_v19 = vpop.f32.mrf.mxu3 }
  0x9b   : > { %v256_v21 = vmax.f32 %v240_v19, 0.0 }
  0x9d   : > { %v262_v22 = vpack.c.bf16 %v256_v21, %v255_v20 }
  0x9f   : > { %342 = vmatmul.bf16.vlgmr.msra.gmra.mxu1 %v262_v22 }
  0xa2   : > { %v243_v23 = vpop.f32.mrf.mxu3 }
  0xa3   : > { %v257_v25 = vmax.f32 %v243_v23, 0.0 }
  0xaa   : > { %v245_v24 = vpop.f32.mrf.mxu3 }
  0xab   : > { %v258_v26 = vmax.f32 %v245_v24, 0.0 }
  0xad   : > { %v263_v27 = vpack.c.bf16 %v258_v26, %v257_v25 }
  0xaf   : > { %347 = vmatmul.bf16.vlgmr.msra.gmra.mxu2 %v263_v27 }
  0xb2   : > { %v248_v28 = vpop.f32.mrf.mxu3 }
  0xb3   : > { %v259_v30 = vmax.f32 %v248_v28, 0.0 }
  0xba   : > { %v250_v29 = vpop.f32.mrf.mxu3 }
  0xbb   : > { %v260_v31 = vmax.f32 %v250_v29, 0.0 }
  0xbd   : > { %v264_v32 = vpack.c.bf16 %v260_v31, %v259_v30 }
  0xbf   : > { %352 = vmatmul.bf16.gmra.mxu2 %v264_v32 }
 0x116   : > { %v764_v33 = vpop.f32.mrf.mxu0 }
 0x117   : > { %v359_v34 = vsel %vm358_vm1, %v764_v33, -inf }
 0x118   : > { %360 = vmax.xlane.f32.xlu0 %v359_v34 }
 0x11c   : > { %v768_v35 = vpop.f32.mrf.mxu1 }
 0x11d   : > { %v365_v36 = vsel %vm358_vm1, %v768_v35, -inf }
 0x11e   : > { %366 = vmax.xlane.f32.xlu1 %v365_v36  ;;  %v772_v37 = vpop.f32.mrf.mxu0 }
 0x11f   : > { %v362_v38 = vsel %vm358_vm1, %v772_v37, -inf }
 0x120   : > { %363 = vmax.xlane.f32.xlu0 %v362_v38 }
 0x124   : > { %v776_v39 = vpop.f32.mrf.mxu1 }
 0x125   : > { %v368_v40 = vsel %vm358_vm1, %v776_v39, -inf }
 0x126   : > { %369 = vmax.xlane.f32.xlu1 %v368_v40 }
 0x132   : > { %v780_v41 = vpop.f32.mrf.mxu2 }
 0x133   : > { %v371_v42 = vsel %vm358_vm1, %v780_v41, -inf }
 0x134   : > { %372 = vmax.xlane.f32.xlu2 %v371_v42 }
 0x13a   : > { %v784_v43 = vpop.f32.mrf.mxu2 }
 0x13b   : > { %v374_v44 = vsel %vm358_vm1, %v784_v43, -inf }
 0x13c   : > { %375 = vmax.xlane.f32.xlu2 %v374_v44 }
 0x142   : > { %v788_v45 = vpop.f32.mrf.mxu2 }
 0x143   : > { %v377_v46 = vsel %vm358_vm1, %v788_v45, -inf }
 0x144   : > { %378 = vmax.xlane.f32.xlu0 %v377_v46 }
 0x14a   : > { %v792_v47 = vpop.f32.mrf.mxu2 }
 0x14b   : > { %v380_v48 = vsel %vm358_vm1, %v792_v47, -inf }
 0x14c   : > { %381 = vmax.xlane.f32.xlu1 %v380_v48 }
 0x18b   : > { %v361_v49 = vpop.xlane.xlu0 %360 }
 0x18c   : > { %v383_v50 = vsub.f32 %v764_v33, %v361_v49 }
 0x18e   : > { %v391_v51 = vmul.f32 1.442695, %v383_v50 }
 0x190   : > { %658 = vpow2.f32 %v391_v51 }
 0x191   : > { %v367_v52 = vpop.xlane.xlu1 %366 }
 0x192   : > { %v385_v53 = vsub.f32 %v768_v35, %v367_v52 }
 0x193   : > { %v364_v54 = vpop.xlane.xlu0 %363 }
 0x194   : > { %v395_v55 = vmul.f32 1.442695, %v385_v53  ;;  %v384_v56 = vsub.f32 %v772_v37, %v364_v54 }
 0x196   : > { %v799_v57 = vpop.eup %658  ;;  %660 = vpow2.f32 %v395_v55  ;;  %v393_v58 = vmul.f32 1.442695, %v384_v56 }
 0x197   : > { %415 = vrot.lane.b32.xlu2 %v799_v57, %s698_s10 }
 0x198   : > { %662 = vpow2.f32 %v393_v58 }
 0x199   : > { %v370_v59 = vpop.xlane.xlu1 %369 }
 0x19a   : > { %v386_v60 = vsub.f32 %v776_v39, %v370_v59 }
 0x19c   : > { %v804_v61 = vpop.eup %660  ;;  %v397_v62 = vmul.f32 1.442695, %v386_v60 }
 0x19d   : > { %419 = vrot.lane.b32.xlu1 %v804_v61, %s698_s10 }
 0x19e   : > { %v808_v63 = vpop.eup %662  ;;  %664 = vpow2.f32 %v397_v62 }
 0x19f   : > { %417 = vrot.lane.b32.xlu0 %v808_v63, %s698_s10 }
 0x1a4   : > { %v665_v0 = vpop.eup %664 }
 0x1a5   : > { %421 = vrot.lane.b32.xlu2 %v665_v0, %s698_s10 }
 0x1a7   : > { %v373_v1 = vpop.xlane.xlu2 %372 }
 0x1a8   : > { %v387_v2 = vsub.f32 %v780_v41, %v373_v1 }
 0x1aa   : > { %v399_v3 = vmul.f32 1.442695, %v387_v2 }
 0x1ac   : > { %666 = vpow2.f32 %v399_v3 }
 0x1af   : > { %v376_v4 = vpop.xlane.xlu2 %375 }
 0x1b0   : > { %v388_v5 = vsub.f32 %v784_v43, %v376_v4 }
 0x1b2   : > { %v815_v6 = vpop.eup %666  ;;  %v401_v7 = vmul.f32 1.442695, %v388_v5 }
 0x1b3   : > { %423 = vrot.lane.b32.xlu0 %v815_v6, %s698_s10 }
 0x1b4   : > { %668 = vpow2.f32 %v401_v7 }
 0x1b7   : > { %v379_v8 = vpop.xlane.xlu0 %378 }
 0x1b8   : > { %v389_v9 = vsub.f32 %v788_v45, %v379_v8 }
 0x1ba   : > { %v820_v10 = vpop.eup %668  ;;  %v403_v11 = vmul.f32 1.442695, %v389_v9 }
 0x1bb   : > { %425 = vrot.lane.b32.xlu2 %v820_v10, %s698_s10 }
 0x1bc   : > { %670 = vpow2.f32 %v403_v11 }
 0x1bf   : > { %v382_v12 = vpop.xlane.xlu1 %381 }
 0x1c0   : > { %v390_v13 = vsub.f32 %v792_v47, %v382_v12 }
 0x1c2   : > { %v825_v14 = vpop.eup %670  ;;  %v405_v15 = vmul.f32 1.442695, %v390_v13 }
 0x1c3   : > { %427 = vrot.lane.b32.xlu1 %v825_v14, %s698_s10 }
 0x1c4   : > { %672 = vpow2.f32 %v405_v15 }
 0x1ca   : > { %v829_v16 = vpop.eup %672 }
 0x1cb   : > { %429 = vrot.lane.b32.xlu0 %v829_v16, %s698_s10 }
 0x1f1   : > { %v416_v17 = vpop.permute.xlu2 %415 }
 0x1f2   : > { %v440_v18 = vsel %vm439_vm2, %v416_v17, 0.0 }
 0x1f3   : > { %441 = vadd.xlane.f32.xlu2 %v440_v18 }
 0x1ff   : > { %v422_v19 = vpop.permute.xlu2 %421 }
 0x200   : > { %v449_v20 = vsel %vm439_vm2, %v422_v19, 0.0 }
 0x201   : > { %450 = vadd.xlane.f32.xlu2 %v449_v20 }
 0x20f   : > { %v420_v21 = vpop.permute.xlu1 %419 }
 0x210   : > { %v446_v22 = vsel %vm439_vm2, %v420_v21, 0.0 }
 0x211   : > { %447 = vadd.xlane.f32.xlu0 %v446_v22  ;;  %v418_v23 = vpop.permute.xlu0 %417 }
 0x212   : > { %v443_v24 = vsel %vm439_vm2, %v418_v23, 0.0 }
 0x213   : > { %444 = vadd.xlane.f32.xlu1 %v443_v24 }
 0x215   : > { %v426_v25 = vpop.permute.xlu2 %425 }
 0x216   : > { %v455_v26 = vsel %vm439_vm2, %v426_v25, 0.0 }
 0x219   : > { %456 = vadd.xlane.f32.xlu0 %v455_v26 }
 0x225   : > { %v424_v27 = vpop.permute.xlu0 %423 }
 0x226   : > { %v452_v28 = vsel %vm439_vm2, %v424_v27, 0.0 }
 0x227   : > { %453 = vadd.xlane.f32.xlu1 %v452_v28 }
 0x235   : > { %v428_v29 = vpop.permute.xlu1 %427 }
 0x236   : > { %v458_v30 = vsel %vm439_vm2, %v428_v29, 0.0 }
 0x237   : > { %459 = vadd.xlane.f32.xlu2 %v458_v30 }
 0x23d   : > { %v430_v31 = vpop.permute.xlu0 %429 }
 0x23e   : > { %v461_v32 = vsel %vm439_vm2, %v430_v31, 0.0 }
 0x23f   : > { %462 = vadd.xlane.f32.xlu1 %v461_v32 }
 0x266   : > { %v442_v34 = vpop.xlane.xlu2 %441 }
 0x267   : > { %674 = vrcp.f32 %v442_v34 }
 0x26d   : > { %v675_v36 = vpop.eup %674 }
 0x26e   : > { %v472_v38 = vmul.f32 %v675_v36, %v799_v57 }
 0x270   : > { %v480_v40 = vsel %vm439_vm2, %v764_v33, %v472_v38 }
 0x271   : > { %488 = vst.msk [vmem:[%s845_s15] sm:$0xff] %vm211_vm0, %v480_v40 }
 0x274   : > { %v451_v42 = vpop.xlane.xlu2 %450 }
 0x275   : > { %676 = vrcp.f32 %v451_v42 }
 0x27b   : > { %v677_v44 = vpop.eup %676 }
 0x27c   : > { %v475_v46 = vmul.f32 %v677_v44, %v665_v0 }
 0x27e   : > { %v483_v48 = vsel %vm439_vm2, %v776_v39, %v475_v46 }
 0x27f   : > { %491 = vst.msk [vmem:[%s845_s15 + $0x18] sm:$0xff] %vm211_vm0, %v483_v48 }
 0x284   : > { %v448_v49 = vpop.xlane.xlu0 %447 }
 0x285   : > { %678 = vrcp.f32 %v448_v49 }
 0x286   : > { %v445_v50 = vpop.xlane.xlu1 %444 }
 0x287   : > { %680 = vrcp.f32 %v445_v50 }
 0x28b   : > { %v679_v51 = vpop.eup %678 }
 0x28c   : > { %v474_v33 = vmul.f32 %v679_v51, %v804_v61  ;;  %v457_v52 = vpop.xlane.xlu0 %456 }
 0x28d   : > { %v681_v53 = vpop.eup %680  ;;  %682 = vrcp.f32 %v457_v52 }
 0x28e   : > { %v482_v54 = vsel %vm439_vm2, %v768_v35, %v474_v33  ;;  %v473_v55 = vmul.f32 %v681_v53, %v808_v63 }
 0x28f   : > { %490 = vst.msk [vmem:[%s845_s15 + $0x10] sm:$0xff] %vm211_vm0, %v482_v54 }
 0x290   : > { %v481_v39 = vsel %vm439_vm2, %v772_v37, %v473_v55 }
 0x291   : > { %489 = vst.msk [vmem:[%s845_s15 + $0x8] sm:$0xff] %vm211_vm0, %v481_v39 }
 0x293   : > { %v683_v56 = vpop.eup %682 }
 0x294   : > { %v477_v57 = vmul.f32 %v683_v56, %v820_v10 }
 0x296   : > { %v485_v58 = vsel %vm439_vm2, %v784_v43, %v477_v57 }
 0x297   : > { %493 = vst.msk [vmem:[%s845_s15 + $0x28] sm:$0xff] %vm211_vm0, %v485_v58 }
 0x29a   : > { %v454_v59 = vpop.xlane.xlu1 %453 }
 0x29b   : > { %684 = vrcp.f32 %v454_v59 }
 0x2a1   : > { %v685_v35 = vpop.eup %684 }
 0x2a2   : > { %v476_v60 = vmul.f32 %v685_v35, %v815_v6 }
 0x2a4   : > { %v484_v37 = vsel %vm439_vm2, %v780_v41, %v476_v60 }
 0x2a5   : > { %492 = vst.msk [vmem:[%s845_s15 + $0x20] sm:$0xff] %vm211_vm0, %v484_v37 }
 0x2aa   : > { %v460_v61 = vpop.xlane.xlu2 %459 }
 0x2ab   : > { %686 = vrcp.f32 %v460_v61 }
 0x2b1   : > { %v687_v62 = vpop.eup %686 }
 0x2b2   : > { %v478_v63 = vmul.f32 %v687_v62, %v825_v14  ;;  %v463_v0 = vpop.xlane.xlu1 %462 }
 0x2b3   : > { %688 = vrcp.f32 %v463_v0 }
 0x2b4   : > { %v486_v43 = vsel %vm439_vm2, %v788_v45, %v478_v63 }
 0x2b5   : > { %494 = vst.msk [vmem:[%s845_s15 + $0x30] sm:$0xff] %vm211_vm0, %v486_v43 }
 0x2b9   : > { %v689_v1 = vpop.eup %688 }
 0x2ba   : > { %v479_v2 = vmul.f32 %v689_v1, %v829_v16 }
 0x2bc   : > { %v487_v41 = vsel %vm439_vm2, %v792_v47, %v479_v2 }
 0x2bd   : > { %495 = vst.msk [vmem:[%s845_s15 + $0x38] sm:$0xff] %vm211_vm0, %v487_v41 }
 0x2be PF: > { %s13_s12 = sadd.s32 1, %s696_s12  }
 0x2bf   : > { %p10_p4 = scmp.ge.s32.totalorder %s13_s12, 4  }
 0x2c1   :  { %12 = sbr.rel (!%p10_p4) target bundleno = 1 (0x1), region = 62 }

</bundles_post_ra>
